<compile_context>
chip_gen: v7x
topology: tpu7x:2x2x1
jax: 0.10.0
libtpu: 0.0.40
codegen_flags: <defaults>
</compile_context>

<pallas_src>
import jax
import jax.numpy as jnp
from jax.experimental import pallas as pl
from jax.experimental.pallas import tpu as pltpu


def _prepper_kernel(x_ref, w_ref, pos_ref, o_ref):
    # x_ref:   (k, N, Pp)  flattened patches for k batch elements
    # w_ref:   (Pp, Dp)    padded linear weight (W^T vs torch layout)
    # pos_ref: (N, Dp)     pos_embedding[0, 1:N+1, :] + bias (padded)
    # o_ref:   (k, N, Dp)  projected patch embeddings
    k, n, pp = x_ref.shape
    x = x_ref[...].reshape(k * n, pp)                         # fold batch into M
    proj = jnp.dot(x, w_ref[...], preferred_element_type=jnp.float32)
    proj = proj.reshape(k, n, -1) + pos_ref[...]              # broadcast over k
    o_ref[...] = proj.astype(o_ref.dtype)


def _pick_group(batch, n, target_rows=512, max_rows=1024):
    """Pick how many batch elements to fold into one grid step.

    Keeps tile_m = k*N in the ~256-1024 row sweet spot when possible, and
    prefers >=2 grid steps (v7x has 2 TensorCores) once the tile is big
    enough.  k always divides batch.
    """
    divisors = [d for d in range(1, batch + 1) if batch % d == 0]
    feasible = [d for d in divisors if d * n <= max(n, max_rows)]
    big = [d for d in feasible if d * n >= target_rows and batch // d >= 2]
    if big:
        return min(big)
    return max(feasible)


def _round_up(x, m):
    return -(-x // m) * m


def prepper_forward(img, w, b, pos_embedding, cls_token, patch_size):
    """img: (B, C, H, W).  Returns (B, num_patches + 1, dim) in img.dtype."""
    B, C, H, W = img.shape
    p = patch_size
    h, w_ = H // p, W // p
    N = h * w_
    P = C * p * p
    D = w.shape[1]
    dtype = img.dtype

    # Rearrange 'b c (h p1) (w p2) -> b (h w) (p1 p2 c)'
    patches = img.reshape(B, C, h, p, w_, p)
    patches = jnp.transpose(patches, (0, 2, 4, 3, 5, 1)).reshape(B, N, P)

    # Lane-dense padding (K and output-lane axes up to multiples of 128).
    Pp = _round_up(P, 128)
    Dp = _round_up(D, 128)
    if Pp != P:
        patches = jnp.pad(patches, ((0, 0), (0, 0), (0, Pp - P)))
    w_pad = w
    if Pp != P or Dp != D:
        w_pad = jnp.pad(w, ((0, Pp - P), (0, Dp - D)))

    # Fold the linear bias into the patch positional embedding.
    posb = pos_embedding[0, 1:N + 1, :] + b[None, :]          # (N, D)
    if Dp != D:
        posb = jnp.pad(posb, ((0, 0), (0, Dp - D)))

    k = _pick_group(B, N)
    grid = (B // k,)

    proj = pl.pallas_call(
        _prepper_kernel,
        out_shape=jax.ShapeDtypeStruct((B, N, Dp), dtype),
        grid_spec=pltpu.PrefetchScalarGridSpec(
            num_scalar_prefetch=0,
            grid=grid,
            in_specs=[
                pl.BlockSpec((k, N, Pp), lambda i: (i, 0, 0)),
                pl.BlockSpec((Pp, Dp), lambda i: (0, 0)),     # resident weight
                pl.BlockSpec((N, Dp), lambda i: (0, 0)),      # resident pos+bias
            ],
            out_specs=pl.BlockSpec((k, N, Dp), lambda i: (i, 0, 0)),
        ),
        compiler_params=pltpu.CompilerParams(
            dimension_semantics=("parallel",)),
    )(patches, w_pad, posb)

    proj = proj[:, :, :D]                                     # drop lane padding

    # cls token + its positional embedding, prepended outside the kernel
    # (keeps the kernel's output tile sublane-aligned, no in-kernel concat).
    cls_row = (cls_token[0, 0, :] + pos_embedding[0, 0, :]).astype(dtype)
    cls_rows = jnp.broadcast_to(cls_row[None, None, :], (B, 1, D))
    out = jnp.concatenate([cls_rows, proj], axis=1)           # (B, N+1, D)

    # TODO(synk): nn.Dropout(emb_dropout) is identity in eval mode; a
    # training-mode kernel would need pltpu.prng_seed/prng_random_bits masking.
    return out


def _reference(img, w, b, pos_embedding, cls_token, patch_size):
    B, C, H, W = img.shape
    p = patch_size
    h, w_ = H // p, W // p
    patches = img.reshape(B, C, h, p, w_, p)
    patches = jnp.transpose(patches, (0, 2, 4, 3, 5, 1)).reshape(B, h * w_, C * p * p)
    x = patches @ w + b
    cls = jnp.broadcast_to(cls_token, (B, 1, w.shape[1]))
    x = jnp.concatenate([cls, x], axis=1)
    return x + pos_embedding[:, :x.shape[1]]


if __name__ == "__main__":
    # Small ViT-ish config
    image_size = 16
    patch_size = 4
    channels = 3
    dim = 32
    B = 2

    num_patches = (image_size // patch_size) ** 2             # 16
    patch_dim = channels * patch_size ** 2                    # 48

    key = jax.random.PRNGKey(0)
    k_img, k_w, k_b, k_pos, k_cls = jax.random.split(key, 5)

    img = jax.random.normal(k_img, (B, channels, image_size, image_size),
                            dtype=jnp.float32)
    # nn.Linear(patch_dim, dim): torch weight is (dim, patch_dim); we keep W^T.
    w = jax.random.normal(k_w, (patch_dim, dim), dtype=jnp.float32) * 0.02
    b = jax.random.normal(k_b, (dim,), dtype=jnp.float32) * 0.02
    pos_embedding = jax.random.normal(k_pos, (1, num_patches + 1, dim),
                                      dtype=jnp.float32)
    cls_token = jax.random.normal(k_cls, (1, 1, dim), dtype=jnp.float32)

    out = prepper_forward(img, w, b, pos_embedding, cls_token, patch_size)
    out = jax.block_until_ready(out)

    ref = _reference(img, w, b, pos_embedding, cls_token, patch_size)
    assert out.shape == (B, num_patches + 1, dim)
    assert jnp.allclose(out, ref, atol=1e-4, rtol=1e-4)
    print("KERNEL_OK")
</pallas_src>

<mosaic_0001>
module attributes {stable_mosaic.version = 11 : i64} {
  func.func @_prepper_kernel(%arg0: i32, %arg1: memref<2x16x128xf32, #tpu.memory_space<vmem>>, %arg2: memref<128x128xf32, #tpu.memory_space<vmem>>, %arg3: memref<16x128xf32, #tpu.memory_space<vmem>>, %arg4: memref<2x16x128xf32, #tpu.memory_space<vmem>>) attributes {dimension_semantics = [#tpu.dimension_semantics<parallel>], iteration_bounds = array<i64: 1>, scalar_prefetch = 0 : i64, scratch_operands = 0 : i64, tpu.core_type = #tpu.core_type<tc>, window_params = [{transform_indices = @transform_0, window_bounds = array<i64: 2, 16, 128>}, {pipeline_mode = #tpu.pipeline_mode<synchronous>, transform_indices = @transform_1, window_bounds = array<i64: 128, 128>}, {pipeline_mode = #tpu.pipeline_mode<synchronous>, transform_indices = @transform_2, window_bounds = array<i64: 16, 128>}, {transform_indices = @transform_3, window_bounds = array<i64: 2, 16, 128>}]} {
    %c0 = arith.constant 0 : index
    %c0_0 = arith.constant 0 : index
    %c0_1 = arith.constant 0 : index
    %0 = vector.load %arg1[%c0, %c0_0, %c0_1] : memref<2x16x128xf32, #tpu.memory_space<vmem>>, vector<2x16x128xf32>
    %1 = vector.shape_cast %0 : vector<2x16x128xf32> to vector<32x128xf32>
    %c0_2 = arith.constant 0 : index
    %c0_3 = arith.constant 0 : index
    %2 = vector.load %arg2[%c0_2, %c0_3] : memref<128x128xf32, #tpu.memory_space<vmem>>, vector<128x128xf32>
    %cst = arith.constant dense<0.000000e+00> : vector<32x128xf32>
    %3 = tpu.matmul %1, %2, %cst {dimension_numbers = #tpu.dot_dimension_numbers<[1], [0], [0], [1], [0, 0, 1, 1], [], []>} : vector<32x128xf32>, vector<128x128xf32>, vector<32x128xf32> -> vector<32x128xf32>
    %4 = vector.shape_cast %3 : vector<32x128xf32> to vector<2x16x128xf32>
    %c0_4 = arith.constant 0 : index
    %c0_5 = arith.constant 0 : index
    %5 = vector.load %arg3[%c0_4, %c0_5] : memref<16x128xf32, #tpu.memory_space<vmem>>, vector<16x128xf32>
    %6 = vector.shape_cast %5 : vector<16x128xf32> to vector<1x16x128xf32>
    %7 = vector.broadcast %6 : vector<1x16x128xf32> to vector<2x16x128xf32>
    %8 = arith.addf %4, %7 : vector<2x16x128xf32>
    %c0_6 = arith.constant 0 : index
    %c0_7 = arith.constant 0 : index
    %c0_8 = arith.constant 0 : index
    %9 = vector.load %arg4[%c0_6, %c0_7, %c0_8] : memref<2x16x128xf32, #tpu.memory_space<vmem>>, vector<2x16x128xf32>
    tpu.vector_store %arg4[%c0_6, %c0_7, %c0_8], %8 {strides = array<i32>} : memref<2x16x128xf32, #tpu.memory_space<vmem>>, vector<2x16x128xf32>,
    return
  }
  func.func @transform_0(%arg0: i32) -> (i32, i32, i32) {
    %c0_i32 = arith.constant 0 : i32
    %c0_i32_0 = arith.constant 0 : i32
    %c0_i32_1 = arith.constant 0 : i32
    return %arg0, %c0_i32, %c0_i32_0 : i32, i32, i32
  }
  func.func @transform_1(%arg0: i32) -> (i32, i32) {
    %c0_i32 = arith.constant 0 : i32
    %c0_i32_0 = arith.constant 0 : i32
    %c0_i32_1 = arith.constant 0 : i32
    return %c0_i32, %c0_i32_0 : i32, i32
  }
  func.func @transform_2(%arg0: i32) -> (i32, i32) {
    %c0_i32 = arith.constant 0 : i32
    %c0_i32_0 = arith.constant 0 : i32
    %c0_i32_1 = arith.constant 0 : i32
    return %c0_i32, %c0_i32_0 : i32, i32
  }
  func.func @transform_3(%arg0: i32) -> (i32, i32, i32) {
    %c0_i32 = arith.constant 0 : i32
    %c0_i32_0 = arith.constant 0 : i32
    %c0_i32_1 = arith.constant 0 : i32
    return %arg0, %c0_i32, %c0_i32_0 : i32, i32, i32
  }
}

</mosaic_0001>

<bundles_post_ra>
// kernel: tpu_custom_call.1
= control target key start
LH: loop header
LB: loop body
LE: loop exit
PB: predicated region body
PF: predicated region fallthrough
CT: control target
= control target key end

     0   :  { %8 = vsyncpa [#allocation3], 0  ;;  %s488_s0 = inlined_call_operand.hbm [shape: f32[2,16,128], index: 0, kind: input, shape index: {}]   ;;  %s489_s1 = inlined_call_operand.hbm [shape: f32[128,128], index: 1, kind: input, shape index: {}]   ;;  %s490_s2 = inlined_call_operand.hbm [shape: f32[16,128], index: 2, kind: input, shape index: {}]   ;;  %s491_s3 = inlined_call_operand.hbm [shape: f32[2,16,128], index: 3, kind: output, shape index: {}]  }
   0x1   :  { %9 = vsyncpa [#allocation6], 0 }
   0x2   :  { %10 = vsyncpa [#allocation4], 0  ;;  %s395_s12 = smov [#allocation5]   ;;  %s396_s14 = smov [#allocation2]  }
   0x3   :  { %s28_s13 = sshll.u32 %s395_s12, 4  ;;  %s16_s15 = sshll.u32 %s396_s14, 4  ;;  %s29_s13 = int_to_ptr.vmem [resolvable:$true] %s28_s13  ;;  %s421_s15 = int_to_ptr.vmem [resolvable:$true] %s16_s15 }
   0x4   :  { %s301_s18 = scalar_lea.hbm %s489_s1, 2048 }
   0x5   :  { %p302_p0 = scmp.ne.s32.totalorder %s489_s1, %s301_s18  ;;  %p305_p1 = scmp.lt.u32.totalorder %s301_s18, %s489_s1 }
   0x7   :  { %p307_p2 = pnand %p305_p1, %p302_p0 }
   0x9   :  { %310 = shalt.err (!%p307_p2)
}
   0xa   :  { %s311_s23 = scalar_lea.vmem %s29_s13, 2048  ;;  %p316_p4 = scmp.lt.s32.totalorder %s29_s13, %s29_s13 }
   0xb   :  { %p312_p3 = scmp.ne.s32.totalorder %s29_s13, %s311_s23  ;;  %p317_p5 = scmp.lt.s32.totalorder %s311_s23, %s311_s23 }
   0xd   :  { %p318_p6 = por %p317_p5, %p316_p4 }
   0xf   :  { %p319_p7 = pnand %p318_p6, %p312_p3 }
  0x11   :  { %322 = shalt.err (!%p319_p7)
}
  0x12   :  { %s397_s24 = smov 128   ;;  %s398_s25 = smov 8  }
  0x13   :  { %34 = dma.hbm_to_vmem [thread:$0]  %s489_s1, 2048, %s29_s13, [#allocation6], %s397_s24, %s397_s24, %s398_s25  }
  0x14   :  { %s323_s30 = scalar_lea.hbm %s488_s0, 512 }
  0x15   :  { %p324_p8 = scmp.ne.s32.totalorder %s488_s0, %s323_s30  ;;  %p327_p9 = scmp.lt.u32.totalorder %s323_s30, %s488_s0 }
  0x17   :  { %p329_p10 = pnand %p327_p9, %p324_p8 }
  0x19   :  { %332 = shalt.err (!%p329_p10)
}
  0x1a   :  { %s333_s8 = scalar_lea.vmem %s421_s15, 512  ;;  %p338_p12 = scmp.lt.s32.totalorder %s421_s15, %s421_s15 }
  0x1b   :  { %p334_p11 = scmp.ne.s32.totalorder %s421_s15, %s333_s8  ;;  %p339_p13 = scmp.lt.s32.totalorder %s333_s8, %s333_s8 }
  0x1d   :  { %p340_p0 = por %p339_p13, %p338_p12 }
  0x1f   :  { %p341_p1 = pnand %p340_p0, %p334_p11 }
  0x21   :  { %344 = shalt.err (!%p341_p1)
}
  0x22   :  { %22 = dma.hbm_to_vmem [thread:$0]  %s488_s0, 512, %s421_s15, [#allocation3], %s397_s24, %s397_s24, %s398_s25  }
  0x23   :  { %s399_s10 = smov [#allocation7]   ;;  %s345_s14 = scalar_lea.hbm %s490_s2, 256 }
  0x24   :  { %s40_s11 = sshll.u32 %s399_s10, 4  ;;  %p346_p2 = scmp.ne.s32.totalorder %s490_s2, %s345_s14  ;;  %s41_s11 = int_to_ptr.vmem [resolvable:$true] %s40_s11 }
  0x25   :  { %p349_p3 = scmp.lt.u32.totalorder %s345_s14, %s490_s2 }
  0x27   :  { %p351_p4 = pnand %p349_p3, %p346_p2 }
  0x29   :  { %354 = shalt.err (!%p351_p4)
}
  0x2a   :  { %s355_s20 = scalar_lea.vmem %s41_s11, 256  ;;  %p360_p6 = scmp.lt.s32.totalorder %s41_s11, %s41_s11 }
  0x2b   :  { %p356_p5 = scmp.ne.s32.totalorder %s41_s11, %s355_s20  ;;  %p361_p7 = scmp.lt.s32.totalorder %s355_s20, %s355_s20 }
  0x2d   :  { %p362_p8 = por %p361_p7, %p360_p6 }
  0x2f   :  { %p363_p9 = pnand %p362_p8, %p356_p5 }
  0x31   :  { %366 = shalt.err (!%p363_p9)
}
  0x32   :  { %46 = dma.hbm_to_vmem [thread:$0]  %s490_s2, 256, %s41_s11, [#allocation6], %s397_s24, %s397_s24, %s398_s25  }
  0x33   :  { %389 = dma.done.wait [#allocation3], 512  }
  0x34   :  { %390 = vsyncadd [#allocation3], 4294966784 }
  0x35   :  { %391 = dma.done.wait [#allocation6], 2304  }
  0x36   :  { %392 = vsyncadd [#allocation6], 4294964992  ;;  %v60_v0 = vld [vmem:[#allocation5] sm:$0xff]  ;;  %v61_v1 = vld [vmem:[#allocation5 + $0x8] sm:$0xff]  ;;  %s400_s2 = smov [#allocation8]  }
  0x37   :  { %v62_v2 = vld [vmem:[#allocation5 + $0x10] sm:$0xff]  ;;  %v247_v3 = vpack.c.bf16 %v61_v1, %v60_v0  ;;  %v63_v4 = vld [vmem:[#allocation5 + $0x18] sm:$0xff]  ;;  %v64_v6 = vld [vmem:[#allocation5 + $0x20] sm:$0xff]  ;;  %s176_s21 = sshll.u32 %s400_s2, 4  ;;  %s177_s21 = int_to_ptr.vmem [resolvable:$true] %s176_s21 }
  0x38   :  { %v251_v5 = vpack.c.bf16 %v63_v4, %v62_v2  ;;  %v65_v7 = vld [vmem:[#allocation5 + $0x28] sm:$0xff]  ;;  %v56_v9 = vld [vmem:[#allocation2] sm:$0xff]  ;;  %v58_v10 = vld [vmem:[#allocation2 + $0x10] sm:$0xff]  ;;  %s367_s22 = scalar_lea.vmem %s177_s21, 512  ;;  %p372_p11 = scmp.lt.s32.totalorder %s177_s21, %s177_s21 }
  0x39   :  { %248 = vmatprep.subr.bf16.mxu0 %v247_v3  ;;  %279 = vmatprep.subr.bf16.mxu1 %v247_v3  ;;  %v255_v8 = vpack.c.bf16 %v65_v7, %v64_v6  ;;  %v66_v11 = vld [vmem:[#allocation5 + $0x30] sm:$0xff]  ;;  %v67_v12 = vld [vmem:[#allocation5 + $0x38] sm:$0xff]  ;;  %v68_v14 = vld [vmem:[#allocation5 + $0x40] sm:$0xff]  ;;  %p368_p10 = scmp.ne.s32.totalorder %s177_s21, %s367_s22  ;;  %p373_p12 = scmp.lt.s32.totalorder %s367_s22, %s367_s22 }
  0x3a   :  { %250 = vmatpush3.bf16.msra.mxu0 %v247_v3  ;;  %287 = vmatpush3.bf16.msra.mxu1 %v247_v3  ;;  %v259_v13 = vpack.c.bf16 %v67_v12, %v66_v11  ;;  %v69_v15 = vld [vmem:[#allocation5 + $0x48] sm:$0xff]  ;;  %v70_v17 = vld [vmem:[#allocation5 + $0x50] sm:$0xff]  ;;  %v71_v18 = vld [vmem:[#allocation5 + $0x58] sm:$0xff] }
  0x3b   :  { %252 = vmatprep.subr.bf16.mxu0 %v251_v5  ;;  %280 = vmatprep.subr.bf16.mxu1 %v251_v5  ;;  %v263_v16 = vpack.c.bf16 %v69_v15, %v68_v14  ;;  %v267_v19 = vpack.c.bf16 %v71_v18, %v70_v17  ;;  %v72_v20 = vld [vmem:[#allocation5 + $0x60] sm:$0xff]  ;;  %v73_v21 = vld [vmem:[#allocation5 + $0x68] sm:$0xff]  ;;  %v74_v23 = vld [vmem:[#allocation5 + $0x70] sm:$0xff]  ;;  %p374_p13 = por %p373_p12, %p372_p11 }
  0x3c   :  { %241 = vmatprep.mubr.f32.mxu0 %v56_v9  ;;  %244 = vmatprep.mubr.f32.mxu1 %v58_v10  ;;  %v271_v22 = vpack.c.bf16 %v73_v21, %v72_v20  ;;  %v75_v24 = vld [vmem:[#allocation5 + $0x78] sm:$0xff]  ;;  %v57_v26 = vld [vmem:[#allocation2 + $0x8] sm:$0xff]  ;;  %v161_v29 = vld [vmem:[#allocation7] sm:$0xff] }
  0x3d   :  { %v275_v25 = vpack.c.bf16 %v75_v24, %v74_v23  ;;  %v59_v27 = vld [vmem:[#allocation2 + $0x18] sm:$0xff]  ;;  %v162_v28 = vld [vmem:[#allocation7 + $0x8] sm:$0xff]  ;;  %p375_p0 = pnand %p374_p13, %p368_p10 }
  0x3e   :  { %254 = vmatpush3.bf16.msra.mxu0 %v251_v5  ;;  %288 = vmatpush3.bf16.msra.mxu1 %v251_v5 }
  0x3f   :  { %256 = vmatprep.subr.bf16.mxu0 %v255_v8  ;;  %281 = vmatprep.subr.bf16.mxu1 %v255_v8 }
  0x42   :  { %258 = vmatpush3.bf16.msra.mxu0 %v255_v8  ;;  %289 = vmatpush3.bf16.msra.mxu1 %v255_v8 }
  0x43   :  { %260 = vmatprep.subr.bf16.mxu0 %v259_v13  ;;  %282 = vmatprep.subr.bf16.mxu1 %v259_v13 }
  0x46   :  { %262 = vmatpush3.bf16.msra.mxu0 %v259_v13  ;;  %290 = vmatpush3.bf16.msra.mxu1 %v259_v13 }
  0x47   :  { %264 = vmatprep.subr.bf16.mxu0 %v263_v16  ;;  %283 = vmatprep.subr.bf16.mxu1 %v263_v16 }
  0x4a   :  { %266 = vmatpush3.bf16.msra.mxu0 %v263_v16  ;;  %291 = vmatpush3.bf16.msra.mxu1 %v263_v16 }
  0x4b   :  { %268 = vmatprep.subr.bf16.mxu0 %v267_v19  ;;  %284 = vmatprep.subr.bf16.mxu1 %v267_v19 }
  0x4e   :  { %270 = vmatpush3.bf16.msra.mxu0 %v267_v19  ;;  %292 = vmatpush3.bf16.msra.mxu1 %v267_v19 }
  0x4f   :  { %272 = vmatprep.subr.bf16.mxu0 %v271_v22  ;;  %285 = vmatprep.subr.bf16.mxu1 %v271_v22 }
  0x52   :  { %274 = vmatpush3.bf16.msra.mxu0 %v271_v22  ;;  %293 = vmatpush3.bf16.msra.mxu1 %v271_v22 }
  0x53   :  { %276 = vmatprep.subr.bf16.mxu0 %v275_v25  ;;  %286 = vmatprep.subr.bf16.mxu1 %v275_v25 }
  0x56   :  { %278 = vmatpush3.bf16.msra.mxu0 %v275_v25  ;;  %294 = vmatpush3.bf16.msra.mxu1 %v275_v25 }
  0x59   :  { %242 = vmatmul.mubr.f32.vlgmr.msra.gmra.mrb[0].mxu0 %v57_v26  ;;  %245 = vmatmul.mubr.f32.vlgmr.msra.gmra.mrb[0].mxu1 %v59_v27 }
 0x12c   :  { %v243_v30 = vpop.f32.mrb[0].mxu0  ;;  %v246_v31 = vpop.f32.mrb[0].mxu1 }
 0x12d   :  { %v164_v32 = vadd.f32 %v243_v30, %v162_v28  ;;  %v166_v33 = vadd.f32 %v246_v31, %v162_v28  ;;  %v142_v34 = vpop.f32.mrb[1].mxu0  ;;  %v152_v35 = vpop.f32.mrb[1].mxu1 }
 0x12e   :  { %v163_v36 = vadd.f32 %v161_v29, %v142_v34  ;;  %v165_v37 = vadd.f32 %v161_v29, %v152_v35 }
 0x12f   :  { %168 = vst [vmem:[#allocation8 + $0x8] sm:$0xff] %v164_v32  ;;  %170 = vst [vmem:[#allocation8 + $0x18] sm:$0xff] %v166_v33 }
 0x130   :  { %167 = vst [vmem:[#allocation8] sm:$0xff] %v163_v36  ;;  %169 = vst [vmem:[#allocation8 + $0x10] sm:$0xff] %v165_v37 }
 0x131   :  { %378 = shalt.err (!%p375_p0)
}
 0x132   :  { %s379_s27 = scalar_lea.hbm %s491_s3, 512 }
 0x133   :  { %p380_p1 = scmp.ne.s32.totalorder %s491_s3, %s379_s27  ;;  %p383_p2 = scmp.lt.u32.totalorder %s379_s27, %s491_s3 }
 0x135   :  { %p385_p3 = pnand %p383_p2, %p380_p1 }
 0x137   :  { %388 = shalt.err (!%p385_p3)
}
 0x138   :  { %182 = dma.vmem_to_hbm [thread:$0]  %s177_s21, 512, %s491_s3, [#allocation4], %s397_s24, %s397_s24, %s398_s25  }
 0x139   :  { %393 = dma.done.wait [#allocation4], 512  }
 0x13a   :  { %394 = vsyncadd [#allocation4], 4294966784 }
 0x13b   :  { %186 = vsyncpa [#allocation3], 1 }
 0x13c   :  { %187 = vsyncpa [#allocation6], 1 }
 0x13d   :  { %188 = vsyncpa [#allocation4], 1 }

</bundles_post_ra>
